<compile_context>
chip_gen: v7x
topology: tpu7x:2x2x1
jax: 0.10.0
libtpu: 0.0.40
codegen_flags: <defaults>
</compile_context>

<pallas_src>
import functools

import jax
import jax.numpy as jnp
from jax.experimental import pallas as pl
from jax.experimental.pallas import tpu as pltpu  # noqa: F401  (TPU backend, kept for clarity)

_LANE = 128       # vreg lane width: hidden/output feature dims padded to a multiple of this
_SUBLANE = 8      # f32 sublane count: batch padded to a multiple of this
_EPS = 1e-5       # RunningMeanStd epsilon (rl_games default)
_CLIP = 5.0       # RunningMeanStd output clamp in eval mode (rl_games default)


def _round_up(x, m):
    return (x + m - 1) // m * m


def _elu(y):
    """ELU(alpha=1) matching torch: y>0 -> y, else expm1(y).

    The negative branch is computed on min(y, 0) so the discarded branch never overflows,
    and a 3-term Taylor series is used for |y| < 1e-2 to keep expm1 accuracy without
    relying on jnp.expm1 lowering. exp() runs on the EUP slot, the polynomial on the VPU,
    so both are free next to the MXU."""
    y_neg = jnp.minimum(y, 0.0)
    taylor = y_neg * (1.0 + y_neg * (0.5 + y_neg * (1.0 / 6.0)))
    neg_branch = jnp.where(jnp.abs(y_neg) < 1e-2, taylor, jnp.exp(y_neg) - 1.0)
    return jnp.where(y > 0, y, neg_branch)


def _make_fused_kernel(num_mid):
    """Kernel refs: (x, stats, w0, w_rest, b, out).

    num_mid = number of hidden layers AFTER the first one (w_rest holds those + the mu head)."""

    def kernel(x_ref, stats_ref, w0_ref, wrest_ref, b_ref, out_ref):
        stats = stats_ref[...]                     # (2, obs_dim): [scale; shift]
        b = b_ref[...]                             # (num_layers, P)

        # 1) RunningMeanStd (eval), pre-folded: clip(x * scale + shift, -5, 5).
        h = jnp.clip(x_ref[...] * stats[0:1, :] + stats[1:2, :], -_CLIP, _CLIP)

        # 2) First hidden layer (K = obs_dim, unpadded lanes on the input side).
        h = _elu(jnp.dot(h, w0_ref[...], preferred_element_type=jnp.float32) + b[0:1, :])

        # 3) Remaining hidden layers, statically unrolled, weights indexed from the stack.
        for i in range(num_mid):
            y = jnp.dot(h, wrest_ref[i], preferred_element_type=jnp.float32) + b[i + 1:i + 2, :]
            h = _elu(y)

        # 4) mu head: plain Linear, no activation (last slice of the stacked weights).
        mu = (jnp.dot(h, wrest_ref[num_mid], preferred_element_type=jnp.float32)
              + b[num_mid + 1:num_mid + 2, :])
        out_ref[...] = mu.astype(out_ref.dtype)

    return kernel


def prepare_params(running_mean, running_var, hidden_params, mu_params, eps=_EPS):
    """One-time packing/padding of all SavingModel constants (call at model-load time).

    hidden_params: list of (W (in, out), b (out,)) for the actor MLP Linear+ELU layers
                   (weights stored pre-transposed vs. PyTorch's (out, in)).
    mu_params:     (W (last_unit, num_actions), b (num_actions,)).
    Zero padding propagates exactly: zero weight rows/cols + zero bias -> y=0 -> ELU(0)=0."""
    assert len(hidden_params) >= 1, "actor MLP expected to have at least one hidden layer"
    layers = list(hidden_params) + [tuple(mu_params)]
    obs_dim = int(running_mean.shape[0])
    out_dims = [int(w.shape[1]) for w, _ in layers]
    num_actions = out_dims[-1]
    p = _round_up(max(out_dims), _LANE)            # common padded width -> weights stackable

    # Fold the eval-mode RunningMeanStd into a single affine: x*scale + shift.
    scale = 1.0 / jnp.sqrt(running_var.astype(jnp.float32) + eps)
    shift = -running_mean.astype(jnp.float32) * scale
    stats = jnp.stack([scale, shift], axis=0)      # (2, obs_dim)

    def pad_w(w, rows, cols):
        r, c = w.shape
        return jnp.pad(w.astype(jnp.float32), ((0, rows - r), (0, cols - c)))

    w0 = pad_w(layers[0][0], obs_dim, p)                                       # (obs_dim, P)
    w_rest = jnp.stack([pad_w(w, p, p) for w, _ in layers[1:]], axis=0)        # (L, P, P)
    b_all = jnp.stack(
        [jnp.pad(b.astype(jnp.float32), (0, p - b.shape[0])) for _, b in layers], axis=0
    )                                                                          # (L+1, P)

    return {"stats": stats, "w0": w0, "w_rest": w_rest, "b": b_all,
            "num_actions": num_actions}


def _full_spec(shape):
    # No grid: every operand is a single full VMEM-resident block.
    return pl.BlockSpec(shape, lambda: (0,) * len(shape))


@functools.partial(jax.jit, static_argnames=("num_actions",))
def _fused_forward(x, stats, w0, w_rest, b_all, num_actions):
    batch, obs_dim = x.shape
    m_pad = _round_up(batch, _SUBLANE)
    p = w0.shape[1]
    num_mid = w_rest.shape[0] - 1                  # hidden layers after the first
    num_layers = num_mid + 2                       # first hidden + mids + mu head

    # Only per-call array prep: pad batch rows to a sublane multiple (rows are independent).
    x_p = jnp.pad(x.astype(jnp.float32), ((0, m_pad - batch), (0, 0)))

    # Advisory cost hint for XLA scheduling of the surrounding graph.
    flops = 2 * m_pad * p * (obs_dim + (num_mid + 1) * p) + m_pad * (3 * obs_dim + 8 * p * (num_layers - 1))
    transcendentals = m_pad * p * (num_layers - 1)
    bytes_accessed = 4 * (x_p.size + stats.size + w0.size + w_rest.size + b_all.size + m_pad * p)

    out = pl.pallas_call(
        _make_fused_kernel(num_mid),
        out_shape=jax.ShapeDtypeStruct((m_pad, p), jnp.float32),
        in_specs=[_full_spec(x_p.shape), _full_spec(stats.shape), _full_spec(w0.shape),
                  _full_spec(w_rest.shape), _full_spec(b_all.shape)],
        out_specs=_full_spec((m_pad, p)),
        cost_estimate=pl.CostEstimate(flops=flops, transcendentals=transcendentals,
                                      bytes_accessed=bytes_accessed),
    )(x_p, stats, w0, w_rest, b_all)

    return out[:batch, :num_actions]


def saving_model_forward(x, packed):
    """Fused SavingModel forward: x (B, obs_dim) f32 -> mu (B, num_actions) f32."""
    return _fused_forward(x, packed["stats"], packed["w0"], packed["w_rest"],
                          packed["b"], packed["num_actions"])


def init_params(key, obs_dim, units, num_actions):
    """Deterministic init with the same shapes/scales as the nn.Linear layers.
    PyTorch stores weight as (out, in); we store the transpose (in, out)."""
    params = []
    in_size = obs_dim
    for out_size in list(units) + [num_actions]:
        key, wk, bk = jax.random.split(key, 3)
        bound = 1.0 / float(in_size) ** 0.5
        w = jax.random.uniform(wk, (in_size, out_size), jnp.float32, -bound, bound)
        b = jax.random.uniform(bk, (out_size,), jnp.float32, -bound, bound)
        params.append((w, b))
        in_size = out_size
    return params


if __name__ == "__main__":
    # Small shapes consistent with the module: batch=8 observations of size 32,
    # actor MLP units [64, 32], 8-dim action space.
    batch = 8
    obs_dim = 32
    units = [64, 32]
    num_actions = 8

    key = jax.random.PRNGKey(0)
    key, xk, mk, vk = jax.random.split(key, 4)
    x = jax.random.normal(xk, (batch, obs_dim), jnp.float32)
    running_mean = 0.1 * jax.random.normal(mk, (obs_dim,), jnp.float32)
    running_var = jax.random.uniform(vk, (obs_dim,), jnp.float32, 0.5, 2.0)

    params = init_params(key, obs_dim, units, num_actions)
    hidden_params, mu_params = params[:-1], params[-1]

    # One-time packing (model load), then the per-call path is a single jitted fused kernel.
    packed = prepare_params(running_mean, running_var, hidden_params, mu_params)

    mu = saving_model_forward(x, packed)
    mu = jax.block_until_ready(mu)

    # Pure-JAX reference of the full SavingModel forward.
    ref = jnp.clip((x - running_mean) / jnp.sqrt(running_var + _EPS), -_CLIP, _CLIP)
    for w, b in hidden_params:
        y = ref @ w + b
        ref = jnp.where(y > 0, y, jnp.expm1(y))
    ref = ref @ mu_params[0] + mu_params[1]

    assert mu.shape == (batch, num_actions)
    assert jnp.allclose(mu, ref, atol=1e-4, rtol=1e-4), float(jnp.max(jnp.abs(mu - ref)))
    print("KERNEL_OK")
</pallas_src>

<mosaic_0001>
module attributes {stable_mosaic.version = 11 : i64} {
  func.func @kernel(%arg0: memref<8x32xf32, #tpu.memory_space<vmem>>, %arg1: memref<2x32xf32, #tpu.memory_space<vmem>>, %arg2: memref<32x128xf32, #tpu.memory_space<vmem>>, %arg3: memref<2x128x128xf32, #tpu.memory_space<vmem>>, %arg4: memref<3x128xf32, #tpu.memory_space<vmem>>, %arg5: memref<8x128xf32, #tpu.memory_space<vmem>>) attributes {dimension_semantics = [], scalar_prefetch = 0 : i64, scratch_operands = 0 : i64, tpu.core_type = #tpu.core_type<tc>} {
    %c0 = arith.constant 0 : index
    %c0_0 = arith.constant 0 : index
    %0 = vector.load %arg1[%c0, %c0_0] : memref<2x32xf32, #tpu.memory_space<vmem>>, vector<2x32xf32>
    %c0_1 = arith.constant 0 : index
    %c0_2 = arith.constant 0 : index
    %1 = vector.load %arg4[%c0_1, %c0_2] : memref<3x128xf32, #tpu.memory_space<vmem>>, vector<3x128xf32>
    %c0_3 = arith.constant 0 : index
    %c0_4 = arith.constant 0 : index
    %2 = vector.load %arg0[%c0_3, %c0_4] : memref<8x32xf32, #tpu.memory_space<vmem>>, vector<8x32xf32>
    %3 = vector.extract_strided_slice %0 {offsets = [0, 0], sizes = [1, 32], strides = [1, 1]} : vector<2x32xf32> to vector<1x32xf32>
    %4 = vector.broadcast %3 : vector<1x32xf32> to vector<8x32xf32>
    %5 = arith.mulf %2, %4 : vector<8x32xf32>
    %6 = vector.extract_strided_slice %0 {offsets = [1, 0], sizes = [1, 32], strides = [1, 1]} : vector<2x32xf32> to vector<1x32xf32>
    %7 = vector.broadcast %6 : vector<1x32xf32> to vector<8x32xf32>
    %8 = arith.addf %5, %7 : vector<8x32xf32>
    %cst = arith.constant -5.000000e+00 : f32
    %cst_5 = arith.constant 5.000000e+00 : f32
    %9 = vector.broadcast %cst : f32 to vector<8x32xf32>
    %10 = arith.maximumf %9, %8 : vector<8x32xf32>
    %11 = vector.broadcast %cst_5 : f32 to vector<8x32xf32>
    %12 = arith.minimumf %11, %10 : vector<8x32xf32>
    %c0_6 = arith.constant 0 : index
    %c0_7 = arith.constant 0 : index
    %13 = vector.load %arg2[%c0_6, %c0_7] : memref<32x128xf32, #tpu.memory_space<vmem>>, vector<32x128xf32>
    %cst_8 = arith.constant dense<0.000000e+00> : vector<8x128xf32>
    %14 = tpu.matmul %12, %13, %cst_8 {dimension_numbers = #tpu.dot_dimension_numbers<[1], [0], [0], [1], [0, 0, 1, 1], [], []>} : vector<8x32xf32>, vector<32x128xf32>, vector<8x128xf32> -> vector<8x128xf32>
    %15 = vector.extract_strided_slice %1 {offsets = [0, 0], sizes = [1, 128], strides = [1, 1]} : vector<3x128xf32> to vector<1x128xf32>
    %16 = vector.broadcast %15 : vector<1x128xf32> to vector<8x128xf32>
    %17 = arith.addf %14, %16 : vector<8x128xf32>
    %cst_9 = arith.constant 0.000000e+00 : f32
    %18 = vector.broadcast %cst_9 : f32 to vector<8x128xf32>
    %19 = arith.minimumf %17, %18 : vector<8x128xf32>
    %cst_10 = arith.constant 0.166666672 : f32
    %20 = vector.broadcast %cst_10 : f32 to vector<8x128xf32>
    %21 = arith.mulf %19, %20 : vector<8x128xf32>
    %cst_11 = arith.constant 5.000000e-01 : f32
    %22 = vector.broadcast %cst_11 : f32 to vector<8x128xf32>
    %23 = arith.addf %22, %21 : vector<8x128xf32>
    %24 = arith.mulf %19, %23 : vector<8x128xf32>
    %cst_12 = arith.constant 1.000000e+00 : f32
    %25 = vector.broadcast %cst_12 : f32 to vector<8x128xf32>
    %26 = arith.addf %25, %24 : vector<8x128xf32>
    %27 = arith.mulf %19, %26 : vector<8x128xf32>
    %28 = math.absf %19 : vector<8x128xf32>
    %cst_13 = arith.constant 0.00999999977 : f32
    %29 = vector.broadcast %cst_13 : f32 to vector<8x128xf32>
    %30 = arith.cmpf olt, %28, %29 : vector<8x128xf32>
    %31 = math.exp %19 : vector<8x128xf32>
    %cst_14 = arith.constant 1.000000e+00 : f32
    %32 = vector.broadcast %cst_14 : f32 to vector<8x128xf32>
    %33 = arith.subf %31, %32 : vector<8x128xf32>
    %34 = arith.select %30, %27, %33 : vector<8x128xi1>, vector<8x128xf32>
    %cst_15 = arith.constant 0.000000e+00 : f32
    %35 = vector.broadcast %cst_15 : f32 to vector<8x128xf32>
    %36 = arith.cmpf ogt, %17, %35 : vector<8x128xf32>
    %37 = arith.select %36, %17, %34 : vector<8x128xi1>, vector<8x128xf32>
    %c0_16 = arith.constant 0 : index
    %c0_17 = arith.constant 0 : index
    %c0_18 = arith.constant 0 : index
    %38 = vector.load %arg3[%c0_16, %c0_17, %c0_18] : memref<2x128x128xf32, #tpu.memory_space<vmem>>, vector<1x128x128xf32>
    %39 = vector.shape_cast %38 : vector<1x128x128xf32> to vector<128x128xf32>
    %cst_19 = arith.constant dense<0.000000e+00> : vector<8x128xf32>
    %40 = tpu.matmul %37, %39, %cst_19 {dimension_numbers = #tpu.dot_dimension_numbers<[1], [0], [0], [1], [0, 0, 1, 1], [], []>} : vector<8x128xf32>, vector<128x128xf32>, vector<8x128xf32> -> vector<8x128xf32>
    %41 = vector.extract_strided_slice %1 {offsets = [1, 0], sizes = [1, 128], strides = [1, 1]} : vector<3x128xf32> to vector<1x128xf32>
    %42 = vector.broadcast %41 : vector<1x128xf32> to vector<8x128xf32>
    %43 = arith.addf %40, %42 : vector<8x128xf32>
    %cst_20 = arith.constant 0.000000e+00 : f32
    %44 = vector.broadcast %cst_20 : f32 to vector<8x128xf32>
    %45 = arith.minimumf %43, %44 : vector<8x128xf32>
    %cst_21 = arith.constant 0.166666672 : f32
    %46 = vector.broadcast %cst_21 : f32 to vector<8x128xf32>
    %47 = arith.mulf %45, %46 : vector<8x128xf32>
    %cst_22 = arith.constant 5.000000e-01 : f32
    %48 = vector.broadcast %cst_22 : f32 to vector<8x128xf32>
    %49 = arith.addf %48, %47 : vector<8x128xf32>
    %50 = arith.mulf %45, %49 : vector<8x128xf32>
    %cst_23 = arith.constant 1.000000e+00 : f32
    %51 = vector.broadcast %cst_23 : f32 to vector<8x128xf32>
    %52 = arith.addf %51, %50 : vector<8x128xf32>
    %53 = arith.mulf %45, %52 : vector<8x128xf32>
    %54 = math.absf %45 : vector<8x128xf32>
    %cst_24 = arith.constant 0.00999999977 : f32
    %55 = vector.broadcast %cst_24 : f32 to vector<8x128xf32>
    %56 = arith.cmpf olt, %54, %55 : vector<8x128xf32>
    %57 = math.exp %45 : vector<8x128xf32>
    %cst_25 = arith.constant 1.000000e+00 : f32
    %58 = vector.broadcast %cst_25 : f32 to vector<8x128xf32>
    %59 = arith.subf %57, %58 : vector<8x128xf32>
    %60 = arith.select %56, %53, %59 : vector<8x128xi1>, vector<8x128xf32>
    %cst_26 = arith.constant 0.000000e+00 : f32
    %61 = vector.broadcast %cst_26 : f32 to vector<8x128xf32>
    %62 = arith.cmpf ogt, %43, %61 : vector<8x128xf32>
    %63 = arith.select %62, %43, %60 : vector<8x128xi1>, vector<8x128xf32>
    %c1 = arith.constant 1 : index
    %c0_27 = arith.constant 0 : index
    %c0_28 = arith.constant 0 : index
    %64 = vector.load %arg3[%c1, %c0_27, %c0_28] : memref<2x128x128xf32, #tpu.memory_space<vmem>>, vector<1x128x128xf32>
    %65 = vector.shape_cast %64 : vector<1x128x128xf32> to vector<128x128xf32>
    %cst_29 = arith.constant dense<0.000000e+00> : vector<8x128xf32>
    %66 = tpu.matmul %63, %65, %cst_29 {dimension_numbers = #tpu.dot_dimension_numbers<[1], [0], [0], [1], [0, 0, 1, 1], [], []>} : vector<8x128xf32>, vector<128x128xf32>, vector<8x128xf32> -> vector<8x128xf32>
    %67 = vector.extract_strided_slice %1 {offsets = [2, 0], sizes = [1, 128], strides = [1, 1]} : vector<3x128xf32> to vector<1x128xf32>
    %68 = vector.broadcast %67 : vector<1x128xf32> to vector<8x128xf32>
    %69 = arith.addf %66, %68 : vector<8x128xf32>
    %c0_30 = arith.constant 0 : index
    %c0_31 = arith.constant 0 : index
    %70 = vector.load %arg5[%c0_30, %c0_31] : memref<8x128xf32, #tpu.memory_space<vmem>>, vector<8x128xf32>
    tpu.vector_store %arg5[%c0_30, %c0_31], %69 {strides = array<i32>} : memref<8x128xf32, #tpu.memory_space<vmem>>, vector<8x128xf32>,
    return
  }
}

</mosaic_0001>

<bundles_post_ra>
// kernel: _fused_forward.1
= control target key start
LH: loop header
LB: loop body
LE: loop exit
PB: predicated region body
PF: predicated region fallthrough
CT: control target
= control target key end

     0   :  { %10 = vsyncpa [#allocation3], 0  ;;  %s806_s0 = inlined_call_operand.hbm [shape: f32[8,32], index: 0, kind: input, shape index: {}]   ;;  %s807_s1 = inlined_call_operand.vmem [shape: f32[2,32], index: 1, kind: input, shape index: {}]   ;;  %s808_s2 = inlined_call_operand.hbm [shape: f32[32,128], index: 2, kind: input, shape index: {}]   ;;  %s809_s3 = inlined_call_operand.hbm [shape: f32[2,128,128], index: 3, kind: input, shape index: {}]   ;;  %s810_s4 = inlined_call_operand.vmem [shape: f32[3,128], index: 4, kind: input, shape index: {}]   ;;  %s811_s5 = inlined_call_operand.hbm [shape: f32[8,128], index: 5, kind: output, shape index: {}]  }
   0x1   :  { %11 = vsyncpa [#allocation6], 0 }
   0x2   :  { %12 = vsyncpa [#allocation4], 0  ;;  %s668_s18 = smov [#allocation5]   ;;  %s574_s22 = scalar_lea.hbm %s808_s2, 512 }
   0x3   :  { %s30_s19 = sshll.u32 %s668_s18, 4  ;;  %p575_p0 = scmp.ne.s32.totalorder %s808_s2, %s574_s22  ;;  %s31_s19 = int_to_ptr.vmem [resolvable:$true] %s30_s19 }
   0x4   :  { %p578_p1 = scmp.lt.u32.totalorder %s574_s22, %s808_s2 }
   0x6   :  { %p580_p2 = pnand %p578_p1, %p575_p0 }
   0x8   :  { %583 = shalt.err (!%p580_p2)
}
   0x9   :  { %s584_s27 = scalar_lea.vmem %s31_s19, 512  ;;  %p589_p4 = scmp.lt.s32.totalorder %s31_s19, %s31_s19 }
   0xa   :  { %p585_p3 = scmp.ne.s32.totalorder %s31_s19, %s584_s27  ;;  %p590_p5 = scmp.lt.s32.totalorder %s584_s27, %s584_s27 }
   0xc   :  { %p591_p6 = por %p590_p5, %p589_p4 }
   0xe   :  { %p592_p7 = pnand %p591_p6, %p585_p3 }
  0x10   :  { %595 = shalt.err (!%p592_p7)
}
  0x11   :  { %s669_s28 = smov 128   ;;  %s670_s29 = smov 8  }
  0x12   :  { %36 = dma.hbm_to_vmem [thread:$0]  %s808_s2, 512, %s31_s19, [#allocation6], %s669_s28, %s669_s28, %s670_s29  }
  0x13   :  { %s671_s7 = smov [#allocation2]   ;;  %s672_s9 = smov [#allocation7]  }
  0x14   :  { %s19_s8 = sshll.u32 %s671_s7, 4  ;;  %s42_s10 = sshll.u32 %s672_s9, 4  ;;  %s20_s8 = int_to_ptr.vmem [resolvable:$true] %s19_s8  ;;  %s43_s10 = int_to_ptr.vmem [resolvable:$true] %s42_s10 }
  0x15   :  { %s596_s13 = scalar_lea.hbm %s806_s0, 128 }
  0x16   :  { %p597_p8 = scmp.ne.s32.totalorder %s806_s0, %s596_s13  ;;  %p600_p9 = scmp.lt.u32.totalorder %s596_s13, %s806_s0 }
  0x18   :  { %p602_p10 = pnand %p600_p9, %p597_p8 }
  0x1a   :  { %605 = shalt.err (!%p602_p10)
}
  0x1b   :  { %s606_s2 = scalar_lea.vmem %s20_s8, 128  ;;  %p611_p12 = scmp.lt.s32.totalorder %s20_s8, %s20_s8 }
  0x1c   :  { %p607_p11 = scmp.ne.s32.totalorder %s20_s8, %s606_s2  ;;  %p612_p13 = scmp.lt.s32.totalorder %s606_s2, %s606_s2 }
  0x1e   :  { %p613_p0 = por %p612_p13, %p611_p12 }
  0x20   :  { %p614_p1 = pnand %p613_p0, %p607_p11 }
  0x22   :  { %617 = shalt.err (!%p614_p1)
}
  0x23   :  { %22 = dma.hbm_to_vmem [thread:$0]  %s806_s0, 128, %s20_s8, [#allocation3]  }
  0x24   :  { %s618_s22 = scalar_lea.hbm %s809_s3, 4096 }
  0x25   :  { %p619_p2 = scmp.ne.s32.totalorder %s809_s3, %s618_s22  ;;  %p622_p3 = scmp.lt.u32.totalorder %s618_s22, %s809_s3 }
  0x27   :  { %p624_p4 = pnand %p622_p3, %p619_p2 }
  0x29   :  { %627 = shalt.err (!%p624_p4)
}
  0x2a   :  { %s628_s27 = scalar_lea.vmem %s43_s10, 4096  ;;  %p633_p6 = scmp.lt.s32.totalorder %s43_s10, %s43_s10 }
  0x2b   :  { %p629_p5 = scmp.ne.s32.totalorder %s43_s10, %s628_s27  ;;  %p634_p7 = scmp.lt.s32.totalorder %s628_s27, %s628_s27 }
  0x2d   :  { %p635_p8 = por %p634_p7, %p633_p6 }
  0x2f   :  { %p636_p9 = pnand %p635_p8, %p629_p5 }
  0x31   :  { %639 = shalt.err (!%p636_p9)
}
  0x32   :  { %48 = dma.hbm_to_vmem [thread:$0]  %s809_s3, 4096, %s43_s10, [#allocation6], %s669_s28, %s669_s28, %s670_s29  }
  0x33   :  { %662 = dma.done.wait [#allocation3], 128  }
  0x34   :  { %663 = vsyncadd [#allocation3], 4294967168 }
  0x35   :  { %664 = dma.done.wait [#allocation6], 4608  }
  0x36   :  { %665 = vsyncadd [#allocation6], 4294962688  ;;  %v63_v0 = vlaneseq  ;;  %v673_v1 = vmov 0.0|0.0   ;;  %vm674_vm0 = vmmov 0   ;;  %v675_v2 = vmov 0.0   ;;  %v75_v6 = vld [vmem:[#allocation5] sm:$0xff] }
  0x37   :  { %507 = vmatprep.subr.bf16.mxu0 %v673_v1  ;;  %434 = vmatprep.mubr.msk.f32.mxu0 %vm674_vm0, %v675_v2  ;;  %v76_v7 = vld [vmem:[#allocation5 + $0x8] sm:$0xff]  ;;  %v77_v8 = vld [vmem:[#allocation5 + $0x10] sm:$0xff]  ;;  %v78_v10 = vld [vmem:[#allocation5 + $0x18] sm:$0xff]  ;;  %vm83_vm1 = vcmask 261120  }
  0x38   :  { %v751_v3 = vshrl.u32 %v63_v0, 7  ;;  %513 = vmatprep.subr.bf16.mxu1 %v673_v1  ;;  %469 = vmatprep.mubr.msk.f32.mxu1 %vm674_vm0, %v675_v2  ;;  %v508_v9 = vpack.c.bf16 %v76_v7, %v75_v6  ;;  %v60_v11 = vld [vmem:[%s807_s1] sm:$0x3]  ;;  %v171_v15 = vld [vmem:[#allocation7] sm:$0xff]  ;;  %v172_v16 = vld [vmem:[#allocation7 + $0x8] sm:$0xff]  ;;  %v511_v18 = vpack.c.bf16 %v78_v10, %v77_v8 }
  0x39   :  { %v62_v12 = vld [vmem:[#allocation2] sm:$0xff]  ;;  %v173_v17 = vld [vmem:[#allocation7 + $0x10] sm:$0xff]  ;;  %v514_v19 = vpack.c.bf16 %v172_v16, %v171_v15  ;;  %v175_v24 = vld [vmem:[#allocation7 + $0x20] sm:$0xff] }
  0x3a   :  { %v65_v4 = vsub.s32 0, %v751_v3  ;;  %v70_v5 = vsub.s32 1, %v751_v3  ;;  %509 = vmatpush3.bf16.msra.mxu0 %v508_v9  ;;  %v174_v20 = vld [vmem:[#allocation7 + $0x18] sm:$0xff]  ;;  %v176_v25 = vld [vmem:[#allocation7 + $0x28] sm:$0xff]  ;;  %v177_v28 = vld [vmem:[#allocation7 + $0x30] sm:$0xff] }
  0x3b   :  { %510 = vmatprep.subr.bf16.mxu0 %v673_v1  ;;  %515 = vmatpush3.bf16.msra.mxu1 %v514_v19  ;;  %v517_v22 = vpack.c.bf16 %v174_v20, %v173_v17  ;;  %v520_v27 = vpack.c.bf16 %v176_v25, %v175_v24  ;;  %v178_v29 = vld [vmem:[#allocation7 + $0x38] sm:$0xff]  ;;  %v179_v31 = vld [vmem:[#allocation7 + $0x40] sm:$0xff]  ;;  %v180_v32 = vld [vmem:[#allocation7 + $0x48] sm:$0xff] }
  0x3c   :  { %v66_v13 = vrot.slane %v60_v11, %v65_v4  ;;  %v71_v14 = vrot.slane %v60_v11, %v70_v5  ;;  %516 = vmatprep.subr.bf16.mxu1 %v673_v1  ;;  %v523_v30 = vpack.c.bf16 %v178_v29, %v177_v28  ;;  %v526_v33 = vpack.c.bf16 %v180_v32, %v179_v31  ;;  %v181_v34 = vld [vmem:[#allocation7 + $0x50] sm:$0xff]  ;;  %v182_v35 = vld [vmem:[#allocation7 + $0x58] sm:$0xff]  ;;  %v183_v37 = vld [vmem:[#allocation7 + $0x60] sm:$0xff] }
  0x3d   :  { %v529_v36 = vpack.c.bf16 %v182_v35, %v181_v34  ;;  %v184_v38 = vld [vmem:[#allocation7 + $0x68] sm:$0xff]  ;;  %v185_v40 = vld [vmem:[#allocation7 + $0x70] sm:$0xff]  ;;  %v186_v41 = vld [vmem:[#allocation7 + $0x78] sm:$0xff] }
  0x3e   :  { %v67_v21 = vmul.f32 %v66_v13, %v62_v12  ;;  %512 = vmatpush3.bf16.msra.mxu0 %v511_v18  ;;  %v532_v39 = vpack.c.bf16 %v184_v38, %v183_v37  ;;  %v535_v42 = vpack.c.bf16 %v186_v41, %v185_v40  ;;  %v276_v43 = vld [vmem:[#allocation7 + $0x80] sm:$0xff]  ;;  %v277_v44 = vld [vmem:[#allocation7 + $0x88] sm:$0xff]  ;;  %v278_v45 = vld [vmem:[#allocation7 + $0x90] sm:$0xff] }
  0x3f   :  { %537 = vmatprep.subr.bf16.mxu0 %v673_v1  ;;  %518 = vmatpush3.bf16.msra.mxu1 %v517_v22  ;;  %v538_v46 = vpack.c.bf16 %v277_v44, %v276_v43  ;;  %v279_v47 = vld [vmem:[#allocation7 + $0x98] sm:$0xff]  ;;  %v280_v49 = vld [vmem:[#allocation7 + $0xa0] sm:$0xff]  ;;  %v281_v50 = vld [vmem:[#allocation7 + $0xa8] sm:$0xff] }
  0x40   :  { %v72_v23 = vadd.f32 %v71_v14, %v67_v21  ;;  %519 = vmatprep.subr.bf16.mxu1 %v673_v1  ;;  %v541_v48 = vpack.c.bf16 %v279_v47, %v278_v45  ;;  %v544_v51 = vpack.c.bf16 %v281_v50, %v280_v49  ;;  %v780_v52 = vld [vmem:[%s810_s4] sm:$0x7]  ;;  %v284_v11 = vld [vmem:[#allocation7 + $0xc0] sm:$0xff]  ;;  %v285_v12 = vld [vmem:[#allocation7 + $0xc8] sm:$0xff]  ;;  %s676_s4 = smov [#allocation8]  }
  0x41   :  { %v82_v53 = vrot.slane %v780_v52, %v65_v4  ;;  %v282_v4 = vld [vmem:[#allocation7 + $0xb0] sm:$0xff]  ;;  %v283_v9 = vld [vmem:[#allocation7 + $0xb8] sm:$0xff]  ;;  %v550_v13 = vpack.c.bf16 %v285_v12, %v284_v11  ;;  %v288_v17 = vld [vmem:[#allocation7 + $0xe0] sm:$0xff]  ;;  %s373_s6 = sshll.u32 %s676_s4, 4  ;;  %s374_s6 = int_to_ptr.vmem [resolvable:$true] %s373_s6 }
  0x42   :  { %v383_v26 = vclamps-f32 %v72_v23, 5.0  ;;  %v547_v10 = vpack.c.bf16 %v283_v9, %v282_v4  ;;  %v286_v14 = vld [vmem:[#allocation7 + $0xd0] sm:$0xff]  ;;  %v287_v15 = vld [vmem:[#allocation7 + $0xd8] sm:$0xff]  ;;  %v289_v18 = vld [vmem:[#allocation7 + $0xe8] sm:$0xff]  ;;  %v190_v23 = vrot.slane %v780_v52, %v70_v5  ;;  %v294_v5 = vsub.s32 2, %v751_v3  ;;  %s640_s7 = scalar_lea.vmem %s374_s6, 128  ;;  %p645_p11 = scmp.lt.s32.totalorder %s374_s6, %s374_s6 }
  0x43   :  { %521 = vmatpush3.bf16.msra.mxu1 %v520_v27  ;;  %v553_v16 = vpack.c.bf16 %v287_v15, %v286_v14  ;;  %v556_v19 = vpack.c.bf16 %v289_v18, %v288_v17  ;;  %v290_v20 = vld [vmem:[#allocation7 + $0xf0] sm:$0xff]  ;;  %v291_v21 = vld [vmem:[#allocation7 + $0xf8] sm:$0xff]  ;;  %p641_p10 = scmp.ne.s32.totalorder %s374_s6, %s640_s7  ;;  %p646_p12 = scmp.lt.s32.totalorder %s640_s7, %s640_s7 }
  0x44   :  { %435 = vmatmul.mubr.msk.f32.vlgmr.msra.gmra.mrb[0].mxu0 %vm83_vm1, %v383_v26  ;;  %522 = vmatprep.subr.bf16.mxu1 %v673_v1  ;;  %v559_v22 = vpack.c.bf16 %v291_v21, %v290_v20  ;;  %v295_v38 = vrot.slane %v780_v52, %v294_v5 }
  0x45   :  { %504 = vmatprep.mubr.msk.f32.mxu0 %vm674_vm0, %v675_v2  ;;  %539 = vmatpush3.bf16.msra.mxu0 %v538_v46  ;;  %p647_p13 = por %p646_p12, %p645_p11 }
  0x46   :  { %540 = vmatprep.subr.bf16.mxu0 %v673_v1 }
  0x47   :  { %524 = vmatpush3.bf16.msra.mxu1 %v523_v30  ;;  %p648_p0 = pnand %p647_p13, %p641_p10 }
  0x48   :  { %525 = vmatprep.subr.bf16.mxu1 %v673_v1 }
  0x49   :  { %542 = vmatpush3.bf16.msra.mxu0 %v541_v48 }
  0x4a   :  { %543 = vmatprep.subr.bf16.mxu0 %v673_v1 }
  0x4b   :  { %527 = vmatpush3.bf16.msra.mxu1 %v526_v33 }
  0x4c   :  { %528 = vmatprep.subr.bf16.mxu1 %v673_v1 }
  0x4d   :  { %545 = vmatpush3.bf16.msra.mxu0 %v544_v51 }
  0x4e   :  { %546 = vmatprep.subr.bf16.mxu0 %v673_v1 }
  0x4f   :  { %530 = vmatpush3.bf16.msra.mxu1 %v529_v36 }
  0x50   :  { %531 = vmatprep.subr.bf16.mxu1 %v673_v1 }
  0x51   :  { %548 = vmatpush3.bf16.msra.mxu0 %v547_v10 }
  0x52   :  { %549 = vmatprep.subr.bf16.mxu0 %v673_v1 }
  0x53   :  { %533 = vmatpush3.bf16.msra.mxu1 %v532_v39 }
  0x54   :  { %534 = vmatprep.subr.bf16.mxu1 %v673_v1 }
  0x55   :  { %551 = vmatpush3.bf16.msra.mxu0 %v550_v13 }
  0x56   :  { %552 = vmatprep.subr.bf16.mxu0 %v673_v1 }
  0x57   :  { %536 = vmatpush3.bf16.msra.mxu1 %v535_v42 }
  0x59   :  { %554 = vmatpush3.bf16.msra.mxu0 %v553_v16 }
  0x5a   :  { %555 = vmatprep.subr.bf16.mxu0 %v673_v1 }
  0x5d   :  { %557 = vmatpush3.bf16.msra.mxu0 %v556_v19 }
  0x5e   :  { %558 = vmatprep.subr.bf16.mxu0 %v673_v1 }
  0x61   :  { %560 = vmatpush3.bf16.msra.mxu0 %v559_v22 }
 0x117   :  { %v153_v54 = vpop.f32.mrb[0].mxu0 }
 0x118   :  { %v154_v55 = vadd.f32 %v153_v54, %v82_v53  ;;  %v436_v56 = vpop.f32.mrb[1].mxu0 }
 0x11a   :  { %v157_v57 = vmin.f32 %v154_v55, 0.0  ;;  %vm169_vm3 = vcmp.gt.f32.partialorder %v154_v55, 0.0 }
 0x11c   :  { %v158_v58 = vmul.f32 0.16666667, %v157_v57  ;;  %v165_v59 = vmul.f32 1.442695, %v157_v57  ;;  %v163_v63 = vand.u32 2147483647, %v157_v57 }
 0x11e   :  { %v159_v60 = vadd.f32 0.5, %v158_v58  ;;  %570 = vpow2.f32 %v165_v59  ;;  %vm164_vm2 = vcmp.lt.f32.partialorder %v163_v63, 0.01 }
 0x120   :  { %v160_v61 = vmul.f32 %v159_v60, %v157_v57 }
 0x122   :  { %v161_v62 = vadd.f32 1.0, %v160_v61 }
 0x124   :  { %v162_v2 = vmul.f32 %v161_v62, %v157_v57 }
 0x128   :  { %v571_v0 = vpop.eup %570 }
 0x129   :  { %v385_v6 = vadd.f32 -1.0, %v571_v0 }
 0x12b   :  { %v168_v7 = vsel %vm164_vm2, %v162_v2, %v385_v6 }
 0x12c   :  { %v170_v8 = vsel %vm169_vm3, %v154_v55, %v168_v7 }
 0x12d   :  { %470 = vmatmul.mubr.f32.vlgmr.msra.gmra.mrb[0].mxu1 %v170_v8 }
 0x200   :  { %v257_v24 = vpop.f32.mrb[0].mxu1 }
 0x201   :  { %v258_v25 = vadd.f32 %v257_v24, %v190_v23  ;;  %v471_v26 = vpop.f32.mrb[1].mxu1 }
 0x203   :  { %v261_v27 = vmin.f32 %v258_v25, 0.0  ;;  %vm273_vm5 = vcmp.gt.f32.partialorder %v258_v25, 0.0 }
 0x205   :  { %v262_v28 = vmul.f32 0.16666667, %v261_v27  ;;  %v269_v29 = vmul.f32 1.442695, %v261_v27  ;;  %v267_v33 = vand.u32 2147483647, %v261_v27 }
 0x207   :  { %v263_v30 = vadd.f32 0.5, %v262_v28  ;;  %572 = vpow2.f32 %v269_v29  ;;  %vm268_vm4 = vcmp.lt.f32.partialorder %v267_v33, 0.01 }
 0x209   :  { %v264_v31 = vmul.f32 %v263_v30, %v261_v27 }
 0x20b   :  { %v265_v32 = vadd.f32 1.0, %v264_v31 }
 0x20d   :  { %v266_v35 = vmul.f32 %v265_v32, %v261_v27 }
 0x211   :  { %v573_v34 = vpop.eup %572 }
 0x212   :  { %v386_v36 = vadd.f32 -1.0, %v573_v34 }
 0x214   :  { %v272_v1 = vsel %vm268_vm4, %v266_v35, %v386_v36 }
 0x215   :  { %v274_v37 = vsel %vm273_vm5, %v258_v25, %v272_v1 }
 0x216   :  { %505 = vmatmul.mubr.f32.vlgmr.msra.gmra.mrb[2].mxu0 %v274_v37 }
 0x2e9   :  { %v362_v39 = vpop.f32.mrb[2].mxu0 }
 0x2ea   :  { %v363_v40 = vadd.f32 %v362_v39, %v295_v38  ;;  %v506_v41 = vpop.f32.mrb[3].mxu0 }
 0x2ec   :  { %366 = vst [vmem:[#allocation8] sm:$0xff] %v363_v40 }
 0x2ed   :  { %651 = shalt.err (!%p648_p0)
}
 0x2ee   :  { %s652_s10 = scalar_lea.hbm %s811_s5, 128 }
 0x2ef   :  { %p653_p1 = scmp.ne.s32.totalorder %s811_s5, %s652_s10  ;;  %p656_p2 = scmp.lt.u32.totalorder %s652_s10, %s811_s5 }
 0x2f1   :  { %p658_p3 = pnand %p656_p2, %p653_p1 }
 0x2f3   :  { %661 = shalt.err (!%p658_p3)
}
 0x2f4   :  { %376 = dma.vmem_to_hbm [thread:$0]  %s374_s6, 128, %s811_s5, [#allocation4]  }
 0x2f5   :  { %666 = dma.done.wait [#allocation4], 128  }
 0x2f6   :  { %667 = vsyncadd [#allocation4], 4294967168 }
 0x2f7   :  { %380 = vsyncpa [#allocation3], 1 }
 0x2f8   :  { %381 = vsyncpa [#allocation6], 1 }
 0x2f9   :  { %382 = vsyncpa [#allocation4], 1 }

</bundles_post_ra>
